<compile_context>
chip_gen: v5e
topology: v5e:2x2
jax: 0.10.0
libtpu: 0.0.40
codegen_flags: <defaults>
</compile_context>

<pallas_src>
import jax
import jax.numpy as jnp
from jax.experimental import pallas as pl
from jax.experimental.pallas import tpu as pltpu

IN_DIM = 3
HIDDEN = 64
OUT_DIM = 2          # setpoint_velocity.shape[1] -> data[:, 3:] assumed 2 columns
DEFAULT_BLOCK_B = 2048


def _mlp_kernel(x_ref, w1_ref, b1_ref, w2_ref, b2_ref, w3t_ref, b3t_ref, o_ref):
    # ---- fc1 + tanh: K=3 matmul done as 3 broadcast FMAs on the VPU ---------
    x = x_ref[...]                        # (TB, 3)  f32
    w1 = w1_ref[...]                      # (3, H)   f32
    h1 = jnp.tanh(b1_ref[...]
                  + x[:, 0:1] * w1[0:1, :]
                  + x[:, 1:2] * w1[1:2, :]
                  + x[:, 2:3] * w1[2:3, :])   # (TB, H)

    # ---- fc2 + tanh: MXU, bf16 inputs, f32 accumulation ----------------------
    h2 = jnp.tanh(
        jnp.dot(h1.astype(jnp.bfloat16), w2_ref[...],
                preferred_element_type=jnp.float32)
        + b2_ref[...])                     # (TB, H) f32

    # ---- fc3, feature-major output: (OUT, H) x (TB, H) -> (OUT, TB) ----------
    # Contraction on the last dim of both operands (NT matmul, same pattern as
    # q @ k^T in attention); the (OUT, TB) store is lane-dense and unpadded.
    y = jax.lax.dot_general(
        w3t_ref[...], h2.astype(jnp.bfloat16),
        dimension_numbers=(((1,), (1,)), ((), ())),
        preferred_element_type=jnp.float32)            # (OUT, TB)
    o_ref[...] = y + b3t_ref[...]                       # b3t: (OUT, 1) broadcast


def _pick_tile(batch, block_b):
    """Batch tile size. Multiple of 128 (lane-dense out store + sublane rule)
    for the multi-step path; full batch for small inputs (full-extent blocks
    are always legal)."""
    if batch <= 256:
        return batch                       # single grid step
    block_b = max(128, (block_b // 128) * 128)          # harden user block_b
    # >= 2 grid steps so v7x's two TensorCores both get work.
    tb = max(256, ((-(-batch // 2) + 127) // 128) * 128)
    return min(block_b, tb)


def velocity_predictor_forward(x, params, *, block_b=DEFAULT_BLOCK_B,
                               feature_major_out=False):
    """x: (B, 3) float32.  Returns (B, 2) (or (2, B) if feature_major_out)."""
    assert x.ndim == 2 and x.shape[1] == IN_DIM, x.shape
    batch = x.shape[0]
    x = x.astype(jnp.float32)

    tb = _pick_tile(batch, block_b)
    grid = (pl.cdiv(batch, tb),)           # trailing block may be partially OOB

    w1 = params["w1"].astype(jnp.float32)              # VPU path stays f32
    b1 = params["b1"].astype(jnp.float32)
    w2 = params["w2"].astype(jnp.bfloat16)             # MXU input
    b2 = params["b2"].astype(jnp.float32)
    w3t = params["w3"].T.astype(jnp.bfloat16)          # (OUT_DIM, HIDDEN)
    b3t = params["b3"].reshape(OUT_DIM, 1).astype(jnp.float32)

    const = lambda arr: pl.BlockSpec(arr.shape, lambda i: (0, 0))

    out_fm = pl.pallas_call(
        _mlp_kernel,
        out_shape=jax.ShapeDtypeStruct((OUT_DIM, batch), jnp.float32),
        grid=grid,
        in_specs=[
            pl.BlockSpec((tb, IN_DIM), lambda i: (i, 0)),   # x: batch-tiled
            const(w1), const(b1),                           # weights/biases resident
            const(w2), const(b2),
            const(w3t), const(b3t),
        ],
        out_specs=pl.BlockSpec((OUT_DIM, tb), lambda i: (0, i)),
        compiler_params=pltpu.CompilerParams(
            dimension_semantics=("parallel",)),
    )(x, w1, b1, w2, b2, w3t, b3t)

    if feature_major_out:
        return out_fm                       # (OUT_DIM, B): zero extra HBM traffic
    return out_fm.T                         # (B, OUT_DIM): PyTorch-layout parity


def init_params(key):
    """Mimics PyTorch nn.Linear default init (U[-1/sqrt(fan_in), 1/sqrt(fan_in)]).

    Weights stored as (in_features, out_features); biases as (1, out_features)
    so y = x @ W + b matches nn.Linear's x @ W.T + b.
    """
    ks = jax.random.split(key, 6)

    def linear(kw, kb, fan_in, fan_out):
        bound = 1.0 / jnp.sqrt(float(fan_in))
        w = jax.random.uniform(kw, (fan_in, fan_out), jnp.float32, -bound, bound)
        b = jax.random.uniform(kb, (1, fan_out), jnp.float32, -bound, bound)
        return w, b

    w1, b1 = linear(ks[0], ks[1], IN_DIM, HIDDEN)
    w2, b2 = linear(ks[2], ks[3], HIDDEN, HIDDEN)
    w3, b3 = linear(ks[4], ks[5], HIDDEN, OUT_DIM)
    return {"w1": w1, "b1": b1, "w2": w2, "b2": b2, "w3": w3, "b3": b3}


def _reference_forward(x, p):
    h1 = jnp.tanh(x @ p["w1"] + p["b1"])
    h2 = jnp.tanh(h1 @ p["w2"] + p["b2"])
    return h2 @ p["w3"] + p["b3"]


if __name__ == "__main__":
    key = jax.random.PRNGKey(0)
    k_x1, k_x2, k_p = jax.random.split(key, 3)
    params = init_params(k_p)

    # Small batch (single grid step, full-extent blocks).
    B1 = 8
    x1 = jax.random.normal(k_x1, (B1, IN_DIM), jnp.float32)
    out1 = jax.block_until_ready(velocity_predictor_forward(x1, params))
    ref1 = _reference_forward(x1, params)
    assert out1.shape == (B1, OUT_DIM), out1.shape
    # bf16 MXU inputs (f32 accumulate) -> loosened tolerance vs f32 reference.
    assert jnp.allclose(out1, ref1, atol=2e-2, rtol=2e-2), "small-batch mismatch"

    # Non-divisible batch exercises the multi-step grid + the partially
    # out-of-bounds trailing block (no wrapper-side padding).
    B2 = 300
    x2 = jax.random.normal(k_x2, (B2, IN_DIM), jnp.float32)
    out2 = jax.block_until_ready(velocity_predictor_forward(x2, params))
    ref2 = _reference_forward(x2, params)
    assert out2.shape == (B2, OUT_DIM), out2.shape
    assert jnp.allclose(out2, ref2, atol=2e-2, rtol=2e-2), "tiled-batch mismatch"

    print("KERNEL_OK")
</pallas_src>

<mosaic_0001>
module attributes {stable_mosaic.version = 11 : i64} {
  func.func @_mlp_kernel(%arg0: i32, %arg1: memref<8x3xf32, #tpu.memory_space<vmem>>, %arg2: memref<3x64xf32, #tpu.memory_space<vmem>>, %arg3: memref<1x64xf32, #tpu.memory_space<vmem>>, %arg4: memref<64x64xbf16, #tpu.memory_space<vmem>>, %arg5: memref<1x64xf32, #tpu.memory_space<vmem>>, %arg6: memref<2x64xbf16, #tpu.memory_space<vmem>>, %arg7: memref<2x1xf32, #tpu.memory_space<vmem>>, %arg8: memref<2x8xf32, #tpu.memory_space<vmem>>) attributes {dimension_semantics = [#tpu.dimension_semantics<parallel>], iteration_bounds = array<i64: 1>, scalar_prefetch = 0 : i64, scratch_operands = 0 : i64, tpu.core_type = #tpu.core_type<tc>, window_params = [{transform_indices = @transform_0, window_bounds = array<i64: 8, 3>}, {pipeline_mode = #tpu.pipeline_mode<synchronous>, transform_indices = @transform_1, window_bounds = array<i64: 3, 64>}, {pipeline_mode = #tpu.pipeline_mode<synchronous>, transform_indices = @transform_2, window_bounds = array<i64: 1, 64>}, {pipeline_mode = #tpu.pipeline_mode<synchronous>, transform_indices = @transform_3, window_bounds = array<i64: 64, 64>}, {pipeline_mode = #tpu.pipeline_mode<synchronous>, transform_indices = @transform_4, window_bounds = array<i64: 1, 64>}, {pipeline_mode = #tpu.pipeline_mode<synchronous>, transform_indices = @transform_5, window_bounds = array<i64: 2, 64>}, {pipeline_mode = #tpu.pipeline_mode<synchronous>, transform_indices = @transform_6, window_bounds = array<i64: 2, 1>}, {transform_indices = @transform_7, window_bounds = array<i64: 2, 8>}]} {
    %c0 = arith.constant 0 : index
    %c0_0 = arith.constant 0 : index
    %0 = vector.load %arg1[%c0, %c0_0] : memref<8x3xf32, #tpu.memory_space<vmem>>, vector<8x3xf32>
    %c0_1 = arith.constant 0 : index
    %c0_2 = arith.constant 0 : index
    %1 = vector.load %arg2[%c0_1, %c0_2] : memref<3x64xf32, #tpu.memory_space<vmem>>, vector<3x64xf32>
    %c0_3 = arith.constant 0 : index
    %c0_4 = arith.constant 0 : index
    %2 = vector.load %arg3[%c0_3, %c0_4] : memref<1x64xf32, #tpu.memory_space<vmem>>, vector<1x64xf32>
    %3 = vector.extract_strided_slice %0 {offsets = [0, 0], sizes = [8, 1], strides = [1, 1]} : vector<8x3xf32> to vector<8x1xf32>
    %4 = vector.extract_strided_slice %1 {offsets = [0, 0], sizes = [1, 64], strides = [1, 1]} : vector<3x64xf32> to vector<1x64xf32>
    %5 = vector.broadcast %3 : vector<8x1xf32> to vector<8x64xf32>
    %6 = vector.broadcast %4 : vector<1x64xf32> to vector<8x64xf32>
    %7 = arith.mulf %5, %6 : vector<8x64xf32>
    %8 = vector.broadcast %2 : vector<1x64xf32> to vector<8x64xf32>
    %9 = arith.addf %8, %7 : vector<8x64xf32>
    %10 = vector.extract_strided_slice %0 {offsets = [0, 1], sizes = [8, 1], strides = [1, 1]} : vector<8x3xf32> to vector<8x1xf32>
    %11 = vector.extract_strided_slice %1 {offsets = [1, 0], sizes = [1, 64], strides = [1, 1]} : vector<3x64xf32> to vector<1x64xf32>
    %12 = vector.broadcast %10 : vector<8x1xf32> to vector<8x64xf32>
    %13 = vector.broadcast %11 : vector<1x64xf32> to vector<8x64xf32>
    %14 = arith.mulf %12, %13 : vector<8x64xf32>
    %15 = arith.addf %9, %14 : vector<8x64xf32>
    %16 = vector.extract_strided_slice %0 {offsets = [0, 2], sizes = [8, 1], strides = [1, 1]} : vector<8x3xf32> to vector<8x1xf32>
    %17 = vector.extract_strided_slice %1 {offsets = [2, 0], sizes = [1, 64], strides = [1, 1]} : vector<3x64xf32> to vector<1x64xf32>
    %18 = vector.broadcast %16 : vector<8x1xf32> to vector<8x64xf32>
    %19 = vector.broadcast %17 : vector<1x64xf32> to vector<8x64xf32>
    %20 = arith.mulf %18, %19 : vector<8x64xf32>
    %21 = arith.addf %15, %20 : vector<8x64xf32>
    %22 = math.tanh %21 : vector<8x64xf32>
    %23 = arith.truncf %22 : vector<8x64xf32> to vector<8x64xbf16>
    %c0_5 = arith.constant 0 : index
    %c0_6 = arith.constant 0 : index
    %24 = vector.load %arg4[%c0_5, %c0_6] : memref<64x64xbf16, #tpu.memory_space<vmem>>, vector<64x64xbf16>
    %cst = arith.constant dense<0.000000e+00> : vector<8x64xf32>
    %25 = tpu.matmul %23, %24, %cst {dimension_numbers = #tpu.dot_dimension_numbers<[1], [0], [0], [1], [0, 0, 1, 1], [], []>} : vector<8x64xbf16>, vector<64x64xbf16>, vector<8x64xf32> -> vector<8x64xf32>
    %c0_7 = arith.constant 0 : index
    %c0_8 = arith.constant 0 : index
    %26 = vector.load %arg5[%c0_7, %c0_8] : memref<1x64xf32, #tpu.memory_space<vmem>>, vector<1x64xf32>
    %27 = vector.broadcast %26 : vector<1x64xf32> to vector<8x64xf32>
    %28 = arith.addf %25, %27 : vector<8x64xf32>
    %29 = math.tanh %28 : vector<8x64xf32>
    %c0_9 = arith.constant 0 : index
    %c0_10 = arith.constant 0 : index
    %30 = vector.load %arg6[%c0_9, %c0_10] : memref<2x64xbf16, #tpu.memory_space<vmem>>, vector<2x64xbf16>
    %31 = arith.truncf %29 : vector<8x64xf32> to vector<8x64xbf16>
    %cst_11 = arith.constant dense<0.000000e+00> : vector<2x8xf32>
    %32 = tpu.matmul %30, %31, %cst_11 {dimension_numbers = #tpu.dot_dimension_numbers<[1], [1], [0], [0], [0, 0, 1, 0], [], []>} : vector<2x64xbf16>, vector<8x64xbf16>, vector<2x8xf32> -> vector<2x8xf32>
    %c0_12 = arith.constant 0 : index
    %c0_13 = arith.constant 0 : index
    %33 = vector.load %arg7[%c0_12, %c0_13] : memref<2x1xf32, #tpu.memory_space<vmem>>, vector<2x1xf32>
    %34 = vector.broadcast %33 : vector<2x1xf32> to vector<2x8xf32>
    %35 = arith.addf %32, %34 : vector<2x8xf32>
    %c0_14 = arith.constant 0 : index
    %c0_15 = arith.constant 0 : index
    %36 = vector.load %arg8[%c0_14, %c0_15] : memref<2x8xf32, #tpu.memory_space<vmem>>, vector<2x8xf32>
    tpu.vector_store %arg8[%c0_14, %c0_15], %35 {strides = array<i32>} : memref<2x8xf32, #tpu.memory_space<vmem>>, vector<2x8xf32>,
    return
  }
  func.func @transform_0(%arg0: i32) -> (i32, i32) {
    %c0_i32 = arith.constant 0 : i32
    %c0_i32_0 = arith.constant 0 : i32
    return %arg0, %c0_i32 : i32, i32
  }
  func.func @transform_1(%arg0: i32) -> (i32, i32) {
    %c0_i32 = arith.constant 0 : i32
    %c0_i32_0 = arith.constant 0 : i32
    %c0_i32_1 = arith.constant 0 : i32
    return %c0_i32, %c0_i32_0 : i32, i32
  }
  func.func @transform_2(%arg0: i32) -> (i32, i32) {
    %c0_i32 = arith.constant 0 : i32
    %c0_i32_0 = arith.constant 0 : i32
    %c0_i32_1 = arith.constant 0 : i32
    return %c0_i32, %c0_i32_0 : i32, i32
  }
  func.func @transform_3(%arg0: i32) -> (i32, i32) {
    %c0_i32 = arith.constant 0 : i32
    %c0_i32_0 = arith.constant 0 : i32
    %c0_i32_1 = arith.constant 0 : i32
    return %c0_i32, %c0_i32_0 : i32, i32
  }
  func.func @transform_4(%arg0: i32) -> (i32, i32) {
    %c0_i32 = arith.constant 0 : i32
    %c0_i32_0 = arith.constant 0 : i32
    %c0_i32_1 = arith.constant 0 : i32
    return %c0_i32, %c0_i32_0 : i32, i32
  }
  func.func @transform_5(%arg0: i32) -> (i32, i32) {
    %c0_i32 = arith.constant 0 : i32
    %c0_i32_0 = arith.constant 0 : i32
    %c0_i32_1 = arith.constant 0 : i32
    return %c0_i32, %c0_i32_0 : i32, i32
  }
  func.func @transform_6(%arg0: i32) -> (i32, i32) {
    %c0_i32 = arith.constant 0 : i32
    %c0_i32_0 = arith.constant 0 : i32
    %c0_i32_1 = arith.constant 0 : i32
    return %c0_i32, %c0_i32_0 : i32, i32
  }
  func.func @transform_7(%arg0: i32) -> (i32, i32) {
    %c0_i32 = arith.constant 0 : i32
    %c0_i32_0 = arith.constant 0 : i32
    return %c0_i32, %arg0 : i32, i32
  }
}

</mosaic_0001>

<bundles_post_ra>
// kernel: tpu_custom_call.1
= control target key start
LH: loop header
LB: loop body
LE: loop exit
PB: predicated region body
PF: predicated region fallthrough
CT: control target
= control target key end

     0   :  { %12 = vsyncpa [#allocation3], 0  ;;  %s337_s0 = inlined_call_operand.vmem [shape: f32[8,3], index: 0, kind: input, shape index: {}]   ;;  %s338_s1 = inlined_call_operand.vmem [shape: f32[3,64], index: 1, kind: input, shape index: {}]   ;;  %s339_s2 = inlined_call_operand.vmem [shape: f32[1,64], index: 2, kind: input, shape index: {}]   ;;  %s340_s3 = inlined_call_operand.hbm [shape: bf16[64,64], index: 3, kind: input, shape index: {}]   ;;  %s341_s4 = inlined_call_operand.vmem [shape: f32[1,64], index: 4, kind: input, shape index: {}]   ;;  %s342_s5 = inlined_call_operand.vmem [shape: bf16[2,64], index: 5, kind: input, shape index: {}]   ;;  %s343_s6 = inlined_call_operand.vmem [shape: f32[2,1], index: 6, kind: input, shape index: {}]   ;;  %s344_s7 = inlined_call_operand.hbm [shape: f32[2,8], index: 7, kind: output, shape index: {}]  }
   0x1   :  { %13 = vsyncpa [#allocation4], 0  ;;  %s24_s26 = sshll.u32 %s340_s3, 4  ;;  %s266_s27 = smov [#allocation2]   ;;  %s25_s26 = int_to_ptr.hbm [resolvable:$true] %s24_s26 }
   0x2   :  { %s26_s28 = sshll.u32 %s266_s27, 4  ;;  %s267_s29 = smov 64   ;;  %s27_s28 = int_to_ptr.vmem [resolvable:$true] %s26_s28 }
   0x3   :  { %s268_s30 = smov 4  }
   0x4   :  { %32 = dma.hbm_to_vmem [thread:$0]  %s25_s26, 512, %s27_s28, [#allocation3], %s267_s29, %s267_s29, %s268_s30  }
   0x5   :  { %262 = dma.done.wait [#allocation3], 512  }
   0x6   :  { %263 = vsyncadd [#allocation3], 4294966784  ;;  %v269_v0 = vmov 0   ;;  %v270_v1 = vmov 2   ;;  %v44_v2 = vld [vmem:[%s337_s0] sm:$0xff]  ;;  %v271_v3 = vmov 1  }
   0x7   :  { %203 = vset.pattern.permute.xlu0 %v269_v0  ;;  %205 = vset.pattern.permute.xlu1 %v270_v1  ;;  %v195_v4 = vld [vmem:[#allocation2 + $0x18] sm:$0xff]  ;;  %v194_v5 = vld [vmem:[#allocation2 + $0x10] sm:$0xff]  ;;  %v193_v6 = vld [vmem:[#allocation2 + $0x8] sm:$0xff]  ;;  %vm110_vm0 = vcmask 523264   ;;  %vm155_vm1 = vcmask 58368  }
   0x8   :  { %49 = vperm.xlu0 %203, %v44_v2   ;;  %66 = vperm.xlu1 %205, %v44_v2   ;;  %v192_v7 = vld [vmem:[#allocation2] sm:$0xff] }
   0x9   :  { %118 = vmatpush.bf16.msra.mxu0 %v195_v4  ;;  %v45_v8 = vld [vmem:[%s338_s1] sm:$0x7] }
   0xa   :  { %v52_v10 = vperm.slane %v45_v8, 0  ;;  %v208_v11 = vld [vmem:[%s339_s2] ss:$0 sm:$0xff]  ;;  %v62_v13 = vperm.slane %v45_v8, 1  ;;  %v69_v14 = vperm.slane %v45_v8, 2 }
   0xb   :  { %v130_v24 = vld [vmem:[%s343_s6] sm:$0x3]  ;;  %s272_s6 = smov [#allocation5]  }
   0xc   :  { %v209_v25 = vld [vmem:[%s341_s4] ss:$0 sm:$0xff]  ;;  %s162_s16 = sshll.u32 %s272_s6, 4  ;;  %s164_s4 = sshll.u32 %s344_s7, 4  ;;  %s163_s16 = int_to_ptr.vmem [resolvable:$true] %s162_s16  ;;  %s165_s4 = int_to_ptr.hbm [resolvable:$true] %s164_s4 }
   0xd   :  { %119 = vmatpush.bf16.msra.mxu0 %v194_v5  ;;  %v128_v32 = vld [vmem:[%s342_s5] sm:$0x1] }
  0x10   :  { %204 = vset.pattern.permute.xlu0 %v271_v3  ;;  %206 = vset.pattern.permute.xlu1 %v269_v0 }
  0x11   :  { %59 = vperm.xlu0 %204, %v44_v2   ;;  %120 = vmatpush.bf16.msra.mxu0 %v193_v6 }
  0x12   :  { %133 = vperm.xlu1 %206, %v130_v24  }
  0x15   :  { %121 = vmatpush.bf16.msra.mxu0 %v192_v7 }
  0x19   :  { %207 = vset.pattern.permute.xlu0 %v269_v0 }
  0x7a   :  { %v50_v9 = vpop.permute.xlu0 %49  ;;  %v67_v15 = vpop.permute.xlu1 %66 }
  0x7b   :  { %v53_v12 = vmul.f32 %v52_v10, %v50_v9  ;;  %v70_v19 = vmul.f32 %v69_v14, %v67_v15 }
  0x7d   :  { %v57_v17 = vadd.f32 %v208_v11, %v53_v12 }
  0x83   :  { %v60_v16 = vpop.permute.xlu0 %59 }
  0x84   :  { %v63_v18 = vmul.f32 %v62_v13, %v60_v16  ;;  %v134_v33 = vpop.permute.xlu1 %133 }
  0x86   :  { %v64_v20 = vadd.f32 %v63_v18, %v57_v17 }
  0x88   :  { %v71_v21 = vadd.f32 %v70_v19, %v64_v20 }
  0x8a   :  { %210 = vtanh.f32 %v71_v21 }
  0x90   :  { %v211_v22 = vpop.eup %210 }
  0x91   :  { %v73_v23 = vpack.c.bf16 %v211_v22, %v211_v22 }
  0x93   :  { %190 = vmatmul.msk.bf16.vlgmr.msra.gmra.mxu0 %vm110_vm0, %v73_v23 }
 0x110   :  { %v123_v26 = vpop.f32.mrf.mxu0 }
 0x111   :  { %v124_v27 = vadd.f32 %v209_v25, %v123_v26 }
 0x113   :  { %212 = vtanh.f32 %v124_v27 }
 0x118   :  { %v125_v28 = vpop.f32.mrf.mxu0 }
 0x119   :  { %v213_v29 = vpop.eup %212 }
 0x11a   :  { %v129_v30 = vpack.c.bf16 %v213_v29, %v213_v29 }
 0x11c   :  { %v140_v31 = vsel %vm110_vm0, %v129_v30, 0 }
 0x11d   :  { %149 = vmatpush.bf16.xpose.msra.mxu1 %v140_v31 }
 0x124   :  { %191 = vmatmul.msk.bf16.vlgmr.msra.gmra.mxu1 %vm110_vm0, %v128_v32 }
 0x1a1   :  { %v151_v34 = vpop.f32.mrf.mxu1 }
 0x1a2   :  { %v152_v35 = vadd.f32 %v151_v34, %v134_v33 }
 0x1a4   :  { %156 = vst.msk [vmem:[#allocation5] sm:$0x3] %vm155_vm1, %v152_v35 }
 0x1a5   :  { %167 = dma.vmem_to_hbm [thread:$0]  %s163_s16, 32, %s165_s4, [#allocation4]  }
 0x1a9   :  { %v153_v36 = vpop.f32.mrf.mxu1 }
 0x1aa   :  { %264 = dma.done.wait [#allocation4], 32  }
 0x1ab   :  { %265 = vsyncadd [#allocation4], 4294967264 }
 0x1ac   :  { %172 = vsyncpa [#allocation3], 1 }
 0x1ad   :  { %173 = vsyncpa [#allocation4], 1 }

</bundles_post_ra>
